<compile_context>
chip_gen: v7x
topology: tpu7x:2x2x1
jax: 0.10.0
libtpu: 0.0.40
codegen_flags: <defaults>
</compile_context>

<pallas_src>
import functools

import jax
import jax.numpy as jnp
from jax import lax
from jax.experimental import pallas as pl
from jax.experimental.pallas import tpu as pltpu

MIB = 1024 * 1024


def hnet1_kernel(x_ref, w1_ref, b1_ref, w2_ref, b2_ref, w3_ref, b3_ref, out_ref,
                 *, npg, lane_dense):
    # fc1 + ReLU : MXU in bf16, f32 accumulate.  x arrives in bf16 (astype is
    # a no-op then).  bias+ReLU+cast fused so the f32 (tb, 512) h1 dies here.
    x = x_ref[...].astype(jnp.bfloat16)                                 # (tb, D)
    h1 = jnp.dot(x, w1_ref[...], preferred_element_type=jnp.float32)   # (tb, 512)
    h1 = jnp.maximum(h1 + b1_ref[...], 0.0).astype(jnp.bfloat16)

    # fc2 + ReLU
    h2 = jnp.dot(h1, w2_ref[...], preferred_element_type=jnp.float32)  # (tb, 128)
    h2 = jnp.maximum(h2 + b2_ref[...], 0.0)

    # fc3 (out_features == 1): VPU multiply + lane reduce instead of an N=1
    # MXU matmul.  With npg == 8 the (tb//npg, npg, 128) view matches the
    # native f32 (8, 128) tiling, so the reshape is layout-free and the lane
    # reduce directly yields grouped logits.
    tb = h2.shape[0]
    gtile = tb // npg
    weighted = h2 * w3_ref[...]                                         # (tb, 128)
    logits = jnp.sum(weighted.reshape(gtile, npg, -1), axis=-1)         # (gtile, npg)
    logits = logits + b3_ref[0, 0]                                      # scalar from SMEM

    if lane_dense:
        # Move the group index onto lanes: (gtile, npg) -> (npg, gtile) so the
        # softmax reduce is a cheap sublane reduce and the store is unmasked
        # and lane-dense.  The sublane->lane relayout is expressed as a tiny
        # identity matmul (npg*npg*gtile MACs, ~0.003% of the fc2 dot); this
        # A@B.T-style dot_general lowers unconditionally and hides under the
        # fc1/fc2 MXU work.
        row = lax.broadcasted_iota(jnp.int32, (npg, npg), 0)
        col = lax.broadcasted_iota(jnp.int32, (npg, npg), 1)
        eye = jnp.where(row == col, 1.0, 0.0).astype(jnp.float32)
        logits = lax.dot_general(eye, logits, (((1,), (1,)), ((), ())),
                                 preferred_element_type=jnp.float32)    # (npg, gtile)
        red_axis = 0
    else:
        red_axis = 1   # small/odd shapes: keep (gtile, npg), reduce over lanes

    # Softmax over each group of npg logits (exact divide: rows sum to 1).
    m = jnp.max(logits, axis=red_axis, keepdims=True)
    e = jnp.exp(logits - m)
    denom = jnp.sum(e, axis=red_axis, keepdims=True)
    out_ref[...] = e / denom


def _vmem_capacity_bytes():
    try:
        return int(pltpu.get_tpu_info().vmem_capacity_bytes)
    except Exception:
        return 64 * MIB           # conservative (v7x-sized) fallback


def _vmem_budget():
    cap = _vmem_capacity_bytes()
    if cap >= 128 * MIB:          # v4 / v5e / v5p / v6e: 128 MiB physical VMEM
        return 8192, 96 * MIB
    if cap >= 64 * MIB:           # v7x: 64 MiB per TensorCore
        return 4096, 48 * MIB
    return 1024, max(4 * MIB, min(cap * 3 // 4, 12 * MIB))


def _pick_tile(batch, npg, max_tb):
    candidates = [t for t in (8192, 4096, 2048, 1024, 512, 256) if t <= max_tb]
    # Largest exact-divisor tile that leaves >= 2 grid steps (keeps both v7x
    # TensorCores busy on the "parallel" batch axis) and holds whole groups
    # with a sublane-aligned group count.
    for t in candidates:
        if batch % t == 0 and t % (8 * npg) == 0 and batch // t >= 2:
            return t
    # Small batch: one tile covering everything (grid == (1,)).
    if batch <= candidates[-1]:
        return batch
    # Large ragged batch: capped tile + padded last step (never tb == batch:
    # a 100k-row tile would make the f32 (tb, 512) h1 blow VMEM everywhere).
    for t in candidates:
        if t % (8 * npg) == 0 and pl.cdiv(batch, t) >= 2:
            return t
    return 8 * npg * max(1, candidates[-1] // (8 * npg))


def hnet1_forward(x, kernel_params, num_per_group, *, tile_b=None,
                  transposed_output=False):
    B, D = x.shape
    npg = num_per_group
    assert B % npg == 0, "batch must be divisible by num_per_group"
    num_groups = B // npg

    max_tb, vmem_limit = _vmem_budget()
    tb = tile_b if tile_b is not None else _pick_tile(B, npg, max_tb)
    assert tb % npg == 0, "tile must hold whole groups"

    # Pad ragged batches up to a tile multiple; padded rows give finite
    # softmax groups that are sliced off below.
    pad = (-B) % tb
    if pad:
        x = jnp.pad(x, ((0, pad), (0, 0)))
    Bp = B + pad
    grid = (Bp // tb,)
    gtile = tb // npg
    Gp = Bp // npg
    assert Bp == tb or gtile % 8 == 0, "multi-tile grids need 8-aligned group tiles"

    # Lane-dense transposed epilogue only when the per-tile group count fills
    # whole 128-lane vregs; otherwise keep the plain (G, npg) layout.
    lane_dense = gtile % 128 == 0

    w1, b1, w2, b2, w3_row, b3 = kernel_params

    def _const(i):   # weights/biases: same block every step -> VMEM-resident
        return (0, 0)

    in_specs = [
        pl.BlockSpec((tb, D), lambda i: (i, 0)),        # x tile (double-buffered)
        pl.BlockSpec(w1.shape, _const),                 # (D, 512) bf16, resident
        pl.BlockSpec(b1.shape, _const),                 # (1, 512) f32
        pl.BlockSpec(w2.shape, _const),                 # (512, 128) bf16
        pl.BlockSpec(b2.shape, _const),                 # (1, 128) f32
        pl.BlockSpec(w3_row.shape, _const),             # (1, 128) f32 row for fc3
        pl.BlockSpec((1, 1), _const,                    # b3 scalar in SMEM
                     memory_space=pltpu.MemorySpace.SMEM),
    ]
    if lane_dense:
        out_shape = jax.ShapeDtypeStruct((npg, Gp), jnp.float32)
        out_spec = pl.BlockSpec((npg, gtile), lambda i: (0, i))
    else:
        out_shape = jax.ShapeDtypeStruct((Gp, npg), jnp.float32)
        out_spec = pl.BlockSpec((gtile, npg), lambda i: (i, 0))

    kernel = functools.partial(hnet1_kernel, npg=npg, lane_dense=lane_dense)

    out = pl.pallas_call(
        kernel,
        out_shape=out_shape,
        grid=grid,
        in_specs=in_specs,
        out_specs=out_spec,
        compiler_params=pltpu.CompilerParams(
            dimension_semantics=("parallel",),          # megacore-shard the batch axis
            vmem_limit_bytes=vmem_limit,                # generation-dependent cap
        ),
    )(x, w1, b1, w2, b2, w3_row, b3)

    if lane_dense:
        if pad:
            out = out[:, :num_groups]
        # (npg, G) is the kernel-native lane-dense layout; transpose the tiny
        # result back to the module's (G, npg) unless the caller wants it raw.
        return out if transposed_output else out.T
    if pad:
        out = out[:num_groups]
    return out


def init_params(key, input_dim):
    # Deterministic init mimicking PyTorch nn.Linear default:
    # uniform(-1/sqrt(fan_in), 1/sqrt(fan_in)) for both weight and bias.
    def linear(k, fan_in, fan_out):
        kw, kb = jax.random.split(k)
        bound = 1.0 / jnp.sqrt(float(fan_in))
        w = jax.random.uniform(kw, (fan_in, fan_out), jnp.float32, -bound, bound)
        b = jax.random.uniform(kb, (1, fan_out), jnp.float32, -bound, bound)
        return w, b

    k1, k2, k3 = jax.random.split(key, 3)
    w1, b1 = linear(k1, input_dim, 512)
    w2, b2 = linear(k2, 512, 128)
    w3, b3 = linear(k3, 128, 1)
    # TODO(synk): bn2 (BatchNorm1d(128)) and sigmoid are initialized in
    # __init__ but unused in forward(); intentionally not implemented.
    return (w1, b1, w2, b2, w3, b3)


def prepare_kernel_params(params_f32):
    """Cast MXU weights to bf16 and lay fc3 out as a (1, 128) row for the VPU."""
    w1, b1, w2, b2, w3, b3 = params_f32
    return (
        w1.astype(jnp.bfloat16), b1,
        w2.astype(jnp.bfloat16), b2,
        jnp.reshape(jnp.transpose(w3), (1, -1)).astype(jnp.float32),  # (1, 128)
        jnp.reshape(b3, (1, 1)).astype(jnp.float32),
    )


def hnet1_reference(x, params_f32, npg):
    w1, b1, w2, b2, w3, b3 = params_f32
    h1 = jnp.maximum(x @ w1 + b1, 0.0)
    h2 = jnp.maximum(h1 @ w2 + b2, 0.0)
    logits = (h2 @ w3 + b3).reshape(-1, npg)
    return jax.nn.softmax(logits, axis=-1)


if __name__ == "__main__":
    input_dim = 32
    num_per_group = 8           # stand-in for args.num_per_group (== n)

    key = jax.random.PRNGKey(0)
    kx1, kx2, kp = jax.random.split(key, 3)
    params_f32 = init_params(kp, input_dim)
    kernel_params = prepare_kernel_params(params_f32)

    # Case 1: small, latency-bound shape (single tile, compat epilogue).
    B1 = 16
    x1 = jax.random.normal(kx1, (B1, input_dim), dtype=jnp.float32)
    out1 = hnet1_forward(x1.astype(jnp.bfloat16), kernel_params, num_per_group)
    out1 = jax.block_until_ready(out1)
    ref1 = hnet1_reference(x1, params_f32, num_per_group)
    assert out1.shape == (B1 // num_per_group, num_per_group)
    assert bool(jnp.all(jnp.abs(jnp.sum(out1, axis=-1) - 1.0) < 1e-3))
    assert bool(jnp.max(jnp.abs(out1 - ref1)) < 5e-2), jnp.max(jnp.abs(out1 - ref1))

    # Case 2: multi-step grid exercising the lane-dense transposed epilogue.
    B2 = 2048
    x2 = jax.random.normal(kx2, (B2, input_dim), dtype=jnp.float32)
    out2 = hnet1_forward(x2.astype(jnp.bfloat16), kernel_params, num_per_group)
    out2 = jax.block_until_ready(out2)
    ref2 = hnet1_reference(x2, params_f32, num_per_group)
    assert out2.shape == (B2 // num_per_group, num_per_group)
    assert bool(jnp.all(jnp.abs(jnp.sum(out2, axis=-1) - 1.0) < 1e-3))
    assert bool(jnp.max(jnp.abs(out2 - ref2)) < 5e-2), jnp.max(jnp.abs(out2 - ref2))

    print("KERNEL_OK")
</pallas_src>

<mosaic_0001>
module attributes {stable_mosaic.version = 11 : i64} {
  func.func @hnet1_kernel(%arg0: i32, %arg1: memref<16x32xbf16, #tpu.memory_space<vmem>>, %arg2: memref<32x512xbf16, #tpu.memory_space<vmem>>, %arg3: memref<1x512xf32, #tpu.memory_space<vmem>>, %arg4: memref<512x128xbf16, #tpu.memory_space<vmem>>, %arg5: memref<1x128xf32, #tpu.memory_space<vmem>>, %arg6: memref<1x128xf32, #tpu.memory_space<vmem>>, %arg7: memref<1x1xf32, #tpu.memory_space<smem>>, %arg8: memref<2x8xf32, #tpu.memory_space<vmem>>) attributes {dimension_semantics = [#tpu.dimension_semantics<parallel>], iteration_bounds = array<i64: 1>, scalar_prefetch = 0 : i64, scratch_operands = 0 : i64, tpu.core_type = #tpu.core_type<tc>, window_params = [{transform_indices = @transform_0, window_bounds = array<i64: 16, 32>}, {pipeline_mode = #tpu.pipeline_mode<synchronous>, transform_indices = @transform_1, window_bounds = array<i64: 32, 512>}, {pipeline_mode = #tpu.pipeline_mode<synchronous>, transform_indices = @transform_2, window_bounds = array<i64: 1, 512>}, {pipeline_mode = #tpu.pipeline_mode<synchronous>, transform_indices = @transform_3, window_bounds = array<i64: 512, 128>}, {pipeline_mode = #tpu.pipeline_mode<synchronous>, transform_indices = @transform_4, window_bounds = array<i64: 1, 128>}, {pipeline_mode = #tpu.pipeline_mode<synchronous>, transform_indices = @transform_5, window_bounds = array<i64: 1, 128>}, {transform_indices = @transform_6, window_bounds = array<i64: 1, 1>}, {transform_indices = @transform_7, window_bounds = array<i64: 2, 8>}]} {
    %c0 = arith.constant 0 : index
    %c0_0 = arith.constant 0 : index
    %0 = vector.load %arg1[%c0, %c0_0] : memref<16x32xbf16, #tpu.memory_space<vmem>>, vector<16x32xbf16>
    %c0_1 = arith.constant 0 : index
    %c0_2 = arith.constant 0 : index
    %1 = vector.load %arg2[%c0_1, %c0_2] : memref<32x512xbf16, #tpu.memory_space<vmem>>, vector<32x512xbf16>
    %cst = arith.constant dense<0.000000e+00> : vector<16x512xf32>
    %2 = tpu.matmul %0, %1, %cst {dimension_numbers = #tpu.dot_dimension_numbers<[1], [0], [0], [1], [0, 0, 1, 1], [], []>} : vector<16x32xbf16>, vector<32x512xbf16>, vector<16x512xf32> -> vector<16x512xf32>
    %c0_3 = arith.constant 0 : index
    %c0_4 = arith.constant 0 : index
    %3 = vector.load %arg3[%c0_3, %c0_4] : memref<1x512xf32, #tpu.memory_space<vmem>>, vector<1x512xf32>
    %4 = vector.broadcast %3 : vector<1x512xf32> to vector<16x512xf32>
    %5 = arith.addf %2, %4 : vector<16x512xf32>
    %cst_5 = arith.constant 0.000000e+00 : f32
    %6 = vector.broadcast %cst_5 : f32 to vector<16x512xf32>
    %7 = arith.maximumf %5, %6 : vector<16x512xf32>
    %8 = arith.truncf %7 : vector<16x512xf32> to vector<16x512xbf16>
    %c0_6 = arith.constant 0 : index
    %c0_7 = arith.constant 0 : index
    %9 = vector.load %arg4[%c0_6, %c0_7] : memref<512x128xbf16, #tpu.memory_space<vmem>>, vector<512x128xbf16>
    %cst_8 = arith.constant dense<0.000000e+00> : vector<16x128xf32>
    %10 = tpu.matmul %8, %9, %cst_8 {dimension_numbers = #tpu.dot_dimension_numbers<[1], [0], [0], [1], [0, 0, 1, 1], [], []>} : vector<16x512xbf16>, vector<512x128xbf16>, vector<16x128xf32> -> vector<16x128xf32>
    %c0_9 = arith.constant 0 : index
    %c0_10 = arith.constant 0 : index
    %11 = vector.load %arg5[%c0_9, %c0_10] : memref<1x128xf32, #tpu.memory_space<vmem>>, vector<1x128xf32>
    %12 = vector.broadcast %11 : vector<1x128xf32> to vector<16x128xf32>
    %13 = arith.addf %10, %12 : vector<16x128xf32>
    %cst_11 = arith.constant 0.000000e+00 : f32
    %14 = vector.broadcast %cst_11 : f32 to vector<16x128xf32>
    %15 = arith.maximumf %13, %14 : vector<16x128xf32>
    %c0_12 = arith.constant 0 : index
    %c0_13 = arith.constant 0 : index
    %16 = vector.load %arg6[%c0_12, %c0_13] : memref<1x128xf32, #tpu.memory_space<vmem>>, vector<1x128xf32>
    %17 = vector.broadcast %16 : vector<1x128xf32> to vector<16x128xf32>
    %18 = arith.mulf %15, %17 : vector<16x128xf32>
    %19 = vector.shape_cast %18 : vector<16x128xf32> to vector<2x8x128xf32>
    %cst_14 = arith.constant dense<0.000000e+00> : vector<2x8xf32>
    %20 = vector.multi_reduction <add>, %19, %cst_14 [2] : vector<2x8x128xf32> to vector<2x8xf32>
    %c0_15 = arith.constant 0 : index
    %c0_16 = arith.constant 0 : index
    %21 = memref.load %arg7[%c0_15, %c0_16] : memref<1x1xf32, #tpu.memory_space<smem>>
    %22 = vector.broadcast %21 : f32 to vector<2x8xf32>
    %23 = arith.addf %20, %22 : vector<2x8xf32>
    %cst_17 = arith.constant dense<0xFF800000> : vector<2xf32>
    %24 = vector.multi_reduction <maximumf>, %23, %cst_17 [1] : vector<2x8xf32> to vector<2xf32>
    %25 = vector.shape_cast %24 : vector<2xf32> to vector<2x1xf32>
    %26 = vector.broadcast %25 : vector<2x1xf32> to vector<2x8xf32>
    %27 = arith.subf %23, %26 : vector<2x8xf32>
    %28 = math.exp %27 : vector<2x8xf32>
    %cst_18 = arith.constant dense<0.000000e+00> : vector<2xf32>
    %29 = vector.multi_reduction <add>, %28, %cst_18 [1] : vector<2x8xf32> to vector<2xf32>
    %30 = vector.shape_cast %29 : vector<2xf32> to vector<2x1xf32>
    %31 = vector.broadcast %30 : vector<2x1xf32> to vector<2x8xf32>
    %32 = arith.divf %28, %31 : vector<2x8xf32>
    %c0_19 = arith.constant 0 : index
    %c0_20 = arith.constant 0 : index
    %33 = vector.load %arg8[%c0_19, %c0_20] : memref<2x8xf32, #tpu.memory_space<vmem>>, vector<2x8xf32>
    tpu.vector_store %arg8[%c0_19, %c0_20], %32 {strides = array<i32>} : memref<2x8xf32, #tpu.memory_space<vmem>>, vector<2x8xf32>,
    return
  }
  func.func @transform_0(%arg0: i32) -> (i32, i32) {
    %c0_i32 = arith.constant 0 : i32
    %c0_i32_0 = arith.constant 0 : i32
    return %arg0, %c0_i32 : i32, i32
  }
  func.func @transform_1(%arg0: i32) -> (i32, i32) {
    %c0_i32 = arith.constant 0 : i32
    %c0_i32_0 = arith.constant 0 : i32
    %c0_i32_1 = arith.constant 0 : i32
    return %c0_i32, %c0_i32_0 : i32, i32
  }
  func.func @transform_2(%arg0: i32) -> (i32, i32) {
    %c0_i32 = arith.constant 0 : i32
    %c0_i32_0 = arith.constant 0 : i32
    %c0_i32_1 = arith.constant 0 : i32
    return %c0_i32, %c0_i32_0 : i32, i32
  }
  func.func @transform_3(%arg0: i32) -> (i32, i32) {
    %c0_i32 = arith.constant 0 : i32
    %c0_i32_0 = arith.constant 0 : i32
    %c0_i32_1 = arith.constant 0 : i32
    return %c0_i32, %c0_i32_0 : i32, i32
  }
  func.func @transform_4(%arg0: i32) -> (i32, i32) {
    %c0_i32 = arith.constant 0 : i32
    %c0_i32_0 = arith.constant 0 : i32
    %c0_i32_1 = arith.constant 0 : i32
    return %c0_i32, %c0_i32_0 : i32, i32
  }
  func.func @transform_5(%arg0: i32) -> (i32, i32) {
    %c0_i32 = arith.constant 0 : i32
    %c0_i32_0 = arith.constant 0 : i32
    %c0_i32_1 = arith.constant 0 : i32
    return %c0_i32, %c0_i32_0 : i32, i32
  }
  func.func @transform_6(%arg0: i32) -> (i32, i32) {
    %c0_i32 = arith.constant 0 : i32
    %c0_i32_0 = arith.constant 0 : i32
    %c0_i32_1 = arith.constant 0 : i32
    return %c0_i32, %c0_i32_0 : i32, i32
  }
  func.func @transform_7(%arg0: i32) -> (i32, i32) {
    %c0_i32 = arith.constant 0 : i32
    %c0_i32_0 = arith.constant 0 : i32
    return %arg0, %c0_i32 : i32, i32
  }
}

</mosaic_0001>

<bundles_post_ra>
// kernel: tpu_custom_call.1
= control target key start
LH: loop header
LB: loop body
LE: loop exit
PB: predicated region body
PF: predicated region fallthrough
CT: control target
= control target key end

     0   :  { %13 = vsyncpa [#allocation4], 0  ;;  %s1101_s0 = inlined_call_operand.hbm [shape: bf16[16,32], index: 0, kind: input, shape index: {}]   ;;  %s1102_s1 = inlined_call_operand.hbm [shape: bf16[32,512], index: 1, kind: input, shape index: {}]   ;;  %s1103_s2 = inlined_call_operand.vmem [shape: f32[1,512], index: 2, kind: input, shape index: {}]   ;;  %s1104_s3 = inlined_call_operand.hbm [shape: bf16[512,128], index: 3, kind: input, shape index: {}]   ;;  %s1105_s4 = inlined_call_operand.vmem [shape: f32[1,128], index: 4, kind: input, shape index: {}]   ;;  %s1106_s5 = inlined_call_operand.vmem [shape: f32[1,128], index: 5, kind: input, shape index: {}]   ;;  %s1107_s6 = inlined_call_operand.<no memory space> [shape: f32[1,1], index: 6, kind: input, shape index: {}]   ;;  %s1108_s7 = inlined_call_operand.hbm [shape: f32[2,8], index: 7, kind: output, shape index: {}]  }
   0x1   :  { %14 = vsyncpa [#allocation7], 0 }
   0x2   :  { %15 = vsyncpa [#allocation5], 0  ;;  %s967_s24 = smov [#allocation6]   ;;  %s873_s28 = scalar_lea.hbm %s1102_s1, 1024 }
   0x3   :  { %s33_s25 = sshll.u32 %s967_s24, 4  ;;  %p874_p0 = scmp.ne.s32.totalorder %s1102_s1, %s873_s28  ;;  %s34_s25 = int_to_ptr.vmem [resolvable:$true] %s33_s25 }
   0x4   :  { %p877_p1 = scmp.lt.u32.totalorder %s873_s28, %s1102_s1 }
   0x6   :  { %p879_p2 = pnand %p877_p1, %p874_p0 }
   0x8   :  { %882 = shalt.err (!%p879_p2)
}
   0x9   :  { %s883_s10 = scalar_lea.vmem %s34_s25, 1024  ;;  %p888_p4 = scmp.lt.s32.totalorder %s34_s25, %s34_s25 }
   0xa   :  { %p884_p3 = scmp.ne.s32.totalorder %s34_s25, %s883_s10  ;;  %p889_p5 = scmp.lt.s32.totalorder %s883_s10, %s883_s10 }
   0xc   :  { %p890_p6 = por %p889_p5, %p888_p4 }
   0xe   :  { %p891_p7 = pnand %p890_p6, %p884_p3 }
  0x10   :  { %894 = shalt.err (!%p891_p7)
}
  0x11   :  { %s968_s11 = smov 256   ;;  %s969_s12 = smov 16  }
  0x12   :  { %39 = dma.hbm_to_vmem [thread:$0]  %s1102_s1, 1024, %s34_s25, [#allocation7], %s968_s11, %s968_s11, %s969_s12  }
  0x13   :  { %s970_s15 = smov [#allocation3]   ;;  %s895_s19 = scalar_lea.hbm %s1101_s0, 128 }
  0x14   :  { %s21_s16 = sshll.u32 %s970_s15, 4  ;;  %p896_p8 = scmp.ne.s32.totalorder %s1101_s0, %s895_s19  ;;  %s22_s16 = int_to_ptr.vmem [resolvable:$true] %s21_s16 }
  0x15   :  { %p899_p9 = scmp.lt.u32.totalorder %s895_s19, %s1101_s0 }
  0x17   :  { %p901_p10 = pnand %p899_p9, %p896_p8 }
  0x19   :  { %904 = shalt.err (!%p901_p10)
}
  0x1a   :  { %s905_s24 = scalar_lea.vmem %s22_s16, 128  ;;  %p910_p12 = scmp.lt.s32.totalorder %s22_s16, %s22_s16 }
  0x1b   :  { %p906_p11 = scmp.ne.s32.totalorder %s22_s16, %s905_s24  ;;  %p911_p13 = scmp.lt.s32.totalorder %s905_s24, %s905_s24 }
  0x1d   :  { %p912_p0 = por %p911_p13, %p910_p12 }
  0x1f   :  { %p913_p1 = pnand %p912_p0, %p906_p11 }
  0x21   :  { %916 = shalt.err (!%p913_p1)
}
  0x22   :  { %s971_s1 = smov 64   ;;  %s972_s25 = smov 4  }
  0x23   :  { %27 = dma.hbm_to_vmem [thread:$0]  %s1101_s0, 128, %s22_s16, [#allocation4], %s971_s1, %s971_s1, %s972_s25  }
  0x24   :  { %s973_s28 = smov [#allocation8]   ;;  %s917_s9 = scalar_lea.hbm %s1104_s3, 4096 }
  0x25   :  { %s47_s29 = sshll.u32 %s973_s28, 4  ;;  %p918_p2 = scmp.ne.s32.totalorder %s1104_s3, %s917_s9  ;;  %s48_s29 = int_to_ptr.vmem [resolvable:$true] %s47_s29 }
  0x26   :  { %p921_p3 = scmp.lt.u32.totalorder %s917_s9, %s1104_s3 }
  0x28   :  { %p923_p4 = pnand %p921_p3, %p918_p2 }
  0x2a   :  { %926 = shalt.err (!%p923_p4)
}
  0x2b   :  { %s927_s14 = scalar_lea.vmem %s48_s29, 4096  ;;  %p932_p6 = scmp.lt.s32.totalorder %s48_s29, %s48_s29 }
  0x2c   :  { %p928_p5 = scmp.ne.s32.totalorder %s48_s29, %s927_s14  ;;  %p933_p7 = scmp.lt.s32.totalorder %s927_s14, %s927_s14 }
  0x2e   :  { %p934_p8 = por %p933_p7, %p932_p6 }
  0x30   :  { %p935_p9 = pnand %p934_p8, %p928_p5 }
  0x32   :  { %938 = shalt.err (!%p935_p9)
}
  0x33   :  { %53 = dma.hbm_to_vmem [thread:$0]  %s1104_s3, 4096, %s48_s29, [#allocation7], %s971_s1, %s971_s1, %s972_s25  }
  0x34   :  { %961 = dma.done.wait [#allocation4], 128  }
  0x35   :  { %962 = vsyncadd [#allocation4], 4294967168 }
  0x36   :  { %963 = dma.done.wait [#allocation7], 5120  }
  0x37   :  { %964 = vsyncadd [#allocation7], 4294962176  ;;  %v974_v0 = vmov 0   ;;  %v820_v1 = vld [vmem:[#allocation6 + $0x4] ss:$16 sps:$4 sm:$0xff]   ;;  %v832_v9 = vld [vmem:[#allocation3] sm:$0xff]   ;;  %v82_v42 = vlaneseq }
  0x38   :  { %183 = vmatprep.mubr.bf16.mxu0 %v974_v0  ;;  %226 = vmatprep.mubr.bf16.mxu1 %v974_v0  ;;  %v822_v2 = vld [vmem:[#allocation6 + $0xc] ss:$16 sps:$4 sm:$0xff]   ;;  %v824_v3 = vld [vmem:[#allocation6] ss:$16 sps:$4 sm:$0xff]   ;;  %v825_v4 = vld [vmem:[#allocation6 + $0x8] ss:$16 sps:$4 sm:$0xff]  }
  0x39   :  { %819 = vset.pattern.permute.xlu0 %v974_v0  ;;  %818 = vset.pattern.permute.xlu1 %v974_v0  ;;  %v826_v5 = vld [vmem:[#allocation6 + $0x24] ss:$16 sps:$4 sm:$0xff]   ;;  %v828_v6 = vld [vmem:[#allocation6 + $0x2c] ss:$16 sps:$4 sm:$0xff]   ;;  %v830_v7 = vld [vmem:[#allocation6 + $0x20] ss:$16 sps:$4 sm:$0xff]  }
  0x3a   :  { %151 = vmatprep.subr.bf16.mxu0 %v820_v1  ;;  %194 = vmatprep.subr.bf16.mxu1 %v822_v2  ;;  %v831_v8 = vld [vmem:[#allocation6 + $0x28] ss:$16 sps:$4 sm:$0xff]   ;;  %v833_v10 = vld [vmem:[#allocation8 + $0x40] sm:$0xff]   ;;  %vm147_vm0 = vcmask 261120   ;;  %v841_v18 = vld [vmem:[#allocation8 + $0x50] sm:$0xff]   ;;  %v1053_v43 = vshrl.u32 %v82_v42, 7 }
  0x3b   :  { %152 = vmatpush1.bf16.msra.mxu0 %v824_v3  ;;  %195 = vmatpush1.bf16.msra.mxu1 %v825_v4  ;;  %v834_v11 = vld [vmem:[#allocation8 + $0xc0] sm:$0xff]   ;;  %v837_v14 = vld [vmem:[#allocation8 + $0x48] sm:$0xff]   ;;  %v842_v19 = vld [vmem:[#allocation8 + $0xd0] sm:$0xff]   ;;  %vm625_vm1 = vcmask 1041409   ;;  %vm628_vm2 = vcmask 58368  }
  0x3c   :  { %153 = vmatprep.subr.bf16.mxu0 %v826_v5  ;;  %196 = vmatprep.subr.bf16.mxu1 %v828_v6  ;;  %v835_v12 = vld [vmem:[#allocation8] sm:$0xff]   ;;  %v838_v15 = vld [vmem:[#allocation8 + $0xc8] sm:$0xff]   ;;  %v843_v20 = vld [vmem:[#allocation8 + $0x10] sm:$0xff]   ;;  %v1056_v44 = vsub.s32 0, %v1053_v43  ;;  %v92_v45 = vsub.s32 2, %v1053_v43  ;;  %v1063_v47 = vsub.s32 1, %v1053_v43 }
  0x3d   :  { %v836_v13 = vld [vmem:[#allocation8 + $0x80] sm:$0xff]   ;;  %v839_v16 = vld [vmem:[#allocation8 + $0x8] sm:$0xff]   ;;  %v844_v21 = vld [vmem:[#allocation8 + $0x90] sm:$0xff]   ;;  %v96_v48 = vsub.s32 3, %v1053_v43 }
  0x3e   :  { %v840_v17 = vld [vmem:[#allocation8 + $0x88] sm:$0xff]   ;;  %v845_v22 = vld [vmem:[#allocation8 + $0x58] sm:$0xff]   ;;  %v849_v26 = vld [vmem:[#allocation8 + $0x60] sm:$0xff]  }
  0x3f   :  { %154 = vmatpush1.bf16.msra.mxu0 %v830_v7  ;;  %197 = vmatpush1.bf16.msra.mxu1 %v831_v8  ;;  %v846_v23 = vld [vmem:[#allocation8 + $0xd8] sm:$0xff]   ;;  %v850_v27 = vld [vmem:[#allocation8 + $0xe0] sm:$0xff]   ;;  %v853_v30 = vld [vmem:[#allocation8 + $0x68] sm:$0xff]  }
  0x40   :  { %765 = vmatprep.subr.bf16.mxu0 %v833_v10  ;;  %787 = vmatprep.subr.bf16.mxu1 %v834_v11  ;;  %v847_v24 = vld [vmem:[#allocation8 + $0x18] sm:$0xff]   ;;  %v851_v28 = vld [vmem:[#allocation8 + $0x20] sm:$0xff]   ;;  %v854_v31 = vld [vmem:[#allocation8 + $0xe8] sm:$0xff]  }
  0x41   :  { %v848_v25 = vld [vmem:[#allocation8 + $0x98] sm:$0xff]   ;;  %v852_v29 = vld [vmem:[#allocation8 + $0xa0] sm:$0xff]   ;;  %v855_v32 = vld [vmem:[#allocation8 + $0x28] sm:$0xff]  }
  0x42   :  { %729 = vmatmul.mubr.msk.bf16.vlgmr.msra.gmra.mrb[0].mxu0 %vm147_vm0, %v832_v9  ;;  %730 = vmatmul.mubr.msk.bf16.vlgmr.msra.gmra.mrb[0].mxu1 %vm147_vm0, %v832_v9  ;;  %v856_v33 = vld [vmem:[#allocation8 + $0xa8] sm:$0xff]   ;;  %v857_v34 = vld [vmem:[#allocation8 + $0x70] sm:$0xff]   ;;  %v861_v38 = vld [vmem:[#allocation8 + $0x78] sm:$0xff]  }
  0x43   :  { %766 = vmatpush3.bf16.msra.mxu0 %v835_v12  ;;  %788 = vmatpush3.bf16.msra.mxu1 %v836_v13  ;;  %v858_v35 = vld [vmem:[#allocation8 + $0xf0] sm:$0xff]   ;;  %v862_v39 = vld [vmem:[#allocation8 + $0xf8] sm:$0xff]  }
  0x44   :  { %767 = vmatprep.subr.bf16.mxu0 %v837_v14  ;;  %789 = vmatprep.subr.bf16.mxu1 %v838_v15  ;;  %v859_v36 = vld [vmem:[#allocation8 + $0x30] sm:$0xff]   ;;  %v863_v40 = vld [vmem:[#allocation8 + $0x38] sm:$0xff]  }
  0x45   :  { %v860_v37 = vld [vmem:[#allocation8 + $0xb0] sm:$0xff]   ;;  %v864_v41 = vld [vmem:[#allocation8 + $0xb8] sm:$0xff]  }
  0x46   :  { %v80_v46 = vld [vmem:[%s1103_s2] sm:$0xf] }
  0x47   :  { %768 = vmatpush3.bf16.msra.mxu0 %v839_v16  ;;  %790 = vmatpush3.bf16.msra.mxu1 %v840_v17  ;;  %v85_v49 = vrot.slane %v80_v46, %v1056_v44  ;;  %v93_v50 = vrot.slane %v80_v46, %v92_v45  ;;  %v89_v51 = vrot.slane %v80_v46, %v1063_v47 }
  0x48   :  { %769 = vmatprep.subr.bf16.mxu0 %v841_v18  ;;  %791 = vmatprep.subr.bf16.mxu1 %v842_v19  ;;  %v97_v52 = vrot.slane %v80_v46, %v96_v48  ;;  %v731_v19 = vld [vmem:[%s1105_s4] ss:$0 sm:$0xff] }
  0x4b   :  { %770 = vmatpush3.bf16.msra.mxu0 %v843_v20  ;;  %792 = vmatpush3.bf16.msra.mxu1 %v844_v21 }
  0x4c   :  { %771 = vmatprep.subr.bf16.mxu0 %v845_v22  ;;  %793 = vmatprep.subr.bf16.mxu1 %v846_v23 }
  0x4f   :  { %772 = vmatpush3.bf16.msra.mxu0 %v847_v24  ;;  %794 = vmatpush3.bf16.msra.mxu1 %v848_v25 }
  0x50   :  { %773 = vmatprep.subr.bf16.mxu0 %v849_v26  ;;  %795 = vmatprep.subr.bf16.mxu1 %v850_v27 }
  0x53   :  { %774 = vmatpush3.bf16.msra.mxu0 %v851_v28  ;;  %796 = vmatpush3.bf16.msra.mxu1 %v852_v29 }
  0x54   :  { %775 = vmatprep.subr.bf16.mxu0 %v853_v30  ;;  %797 = vmatprep.subr.bf16.mxu1 %v854_v31 }
  0x57   :  { %776 = vmatpush3.bf16.msra.mxu0 %v855_v32  ;;  %798 = vmatpush3.bf16.msra.mxu1 %v856_v33  ;;  %v764_v33 = vld [vmem:[%s1106_s5] ss:$0 sm:$0xff]  ;;  %s975_s5 = smov [#allocation9]  }
  0x58   :  { %777 = vmatprep.subr.bf16.mxu0 %v857_v34  ;;  %799 = vmatprep.subr.bf16.mxu1 %v858_v35 }
  0x5b   :  { %778 = vmatpush3.bf16.msra.mxu0 %v859_v36  ;;  %800 = vmatpush3.bf16.msra.mxu1 %v860_v37 }
  0x5c   :  { %779 = vmatprep.subr.bf16.mxu0 %v861_v38  ;;  %801 = vmatprep.subr.bf16.mxu1 %v862_v39  ;;  %v616_v39 = vand.u32 127, %v82_v42 }
  0x5e   :  { %v619_v45 = vsub.s32 %v616_v39, %v1053_v43 }
  0x5f   :  { %780 = vmatpush3.bf16.msra.mxu0 %v863_v40  ;;  %802 = vmatpush3.bf16.msra.mxu1 %v864_v41  ;;  %v610_v40 = vstv %s1107_s6  ;;  %s710_s6 = sshll.u32 %s975_s5, 4  ;;  %s711_s6 = int_to_ptr.vmem [resolvable:$true] %s710_s6 }
  0x60   :  { %s939_s21 = scalar_lea.vmem %s711_s6, 32  ;;  %p944_p11 = scmp.lt.s32.totalorder %s711_s6, %s711_s6 }
  0x61   :  { %p940_p10 = scmp.ne.s32.totalorder %s711_s6, %s939_s21  ;;  %p945_p12 = scmp.lt.s32.totalorder %s939_s21, %s939_s21 }
  0x63   :  { %p946_p13 = por %p945_p12, %p944_p11 }
  0x65   :  { %p947_p0 = pnand %p946_p13, %p940_p10 }
 0x115   :  { %v185_v53 = vpop.f32.mrb[0].mxu0  ;;  %v228_v54 = vpop.f32.mrb[0].mxu1 }
 0x116   :  { %v186_v55 = vadd.f32 %v185_v53, %v85_v49  ;;  %v229_v56 = vadd.f32 %v228_v54, %v93_v50  ;;  %v187_v57 = vpop.f32.mrb[1].mxu0  ;;  %v230_v58 = vpop.f32.mrb[1].mxu1 }
 0x117   :  { %v188_v59 = vadd.f32 %v187_v57, %v89_v51  ;;  %v231_v60 = vadd.f32 %v230_v58, %v97_v52  ;;  %v189_v61 = vpop.f32.mrb[2].mxu0  ;;  %v232_v62 = vpop.f32.mrb[2].mxu1 }
 0x118   :  { %v239_v63 = vmax.f32 %v229_v56, 0.0  ;;  %v190_v0 = vadd.f32 %v189_v61, %v85_v49  ;;  %v233_v1 = vadd.f32 %v232_v62, %v93_v50  ;;  %v191_v2 = vpop.f32.mrb[3].mxu0  ;;  %v234_v3 = vpop.f32.mrb[3].mxu1  ;;  %v237_v7 = vmax.f32 %v186_v55, 0.0 }
 0x119   :  { %v240_v4 = vmax.f32 %v231_v60, 0.0  ;;  %v192_v5 = vadd.f32 %v191_v2, %v89_v51  ;;  %v235_v6 = vadd.f32 %v234_v3, %v97_v52  ;;  %v238_v10 = vmax.f32 %v188_v59, 0.0 }
 0x11a   :  { %v241_v8 = vmax.f32 %v190_v0, 0.0  ;;  %v243_v9 = vmax.f32 %v233_v1, 0.0 }
 0x11b   :  { %v242_v11 = vmax.f32 %v192_v5, 0.0  ;;  %v244_v12 = vmax.f32 %v235_v6, 0.0 }
 0x11c   :  { %v245_v13 = vpack.c.bf16 %v241_v8, %v237_v7  ;;  %v247_v14 = vpack.c.bf16 %v243_v9, %v239_v63 }
 0x11d   :  { %v246_v15 = vpack.c.bf16 %v242_v11, %v238_v10  ;;  %v248_v16 = vpack.c.bf16 %v244_v12, %v240_v4 }
 0x11f   :  { %544 = vmatprep.mubr.bf16.mxu0 %v246_v15  ;;  %585 = vmatprep.mubr.bf16.mxu1 %v248_v16 }
 0x120   :  { %545 = vmatmul.mubr.bf16.vlgmr.msra.gmra.mrb[4].mxu0 %v245_v13  ;;  %586 = vmatmul.mubr.bf16.vlgmr.msra.gmra.mrb[4].mxu1 %v247_v14 }
 0x1f3   :  { %v781_v17 = vpop.f32.mrb[4].mxu0  ;;  %v803_v18 = vpop.f32.mrb[4].mxu1 }
 0x1f4   :  { %v782_v20 = vpop.f32.mrb[5].mxu0  ;;  %v804_v21 = vpop.f32.mrb[5].mxu1 }
 0x1f5   :  { %v783_v22 = vadd.f32 %v782_v20, %v781_v17  ;;  %v805_v23 = vadd.f32 %v804_v21, %v803_v18  ;;  %v784_v24 = vpop.f32.mrb[6].mxu0  ;;  %v806_v25 = vpop.f32.mrb[6].mxu1 }
 0x1f6   :  { %v785_v26 = vpop.f32.mrb[7].mxu0  ;;  %v807_v27 = vpop.f32.mrb[7].mxu1 }
 0x1f7   :  { %v547_v28 = vadd.f32 %v783_v22, %v731_v19  ;;  %v786_v29 = vadd.f32 %v785_v26, %v784_v24  ;;  %v808_v30 = vadd.f32 %v807_v27, %v806_v25 }
 0x1f9   :  { %v550_v31 = vadd.f32 %v786_v29, %v731_v19  ;;  %v588_v32 = vadd.f32 %v805_v23, %v547_v28 }
 0x1fb   :  { %v591_v34 = vadd.f32 %v808_v30, %v550_v31  ;;  %v594_v35 = vmax.f32 %v588_v32, 0.0 }
 0x1fd   :  { %v595_v36 = vmax.f32 %v591_v34, 0.0  ;;  %v603_v37 = vmul.f32 %v764_v33, %v594_v35 }
 0x1ff   :  { %605 = vadd.xlane.f32.xlu0 %v603_v37  ;;  %v604_v38 = vmul.f32 %v764_v33, %v595_v36 }
 0x203   :  { %607 = vadd.xlane.f32.xlu0 %v604_v38 }
 0x28c   :  { %v606_v41 = vpop.xlane.xlu0 %605 }
 0x28d   :  { %v611_v46 = vadd.f32 %v610_v40, %v606_v41 }
 0x28f   :  { %v620_v50 = vrot.slane %v611_v46, %v619_v45 }
 0x290   :  { %v608_v48 = vpop.xlane.xlu0 %607 }
 0x291   :  { %v612_v49 = vadd.f32 %v610_v40, %v608_v48 }
 0x293   :  { %v624_v51 = vrot.slane %v612_v49, %v619_v45 }
 0x295   :  { %v626_v52 = vsel %vm625_vm1, %v624_v51, %v620_v50 }
 0x296   :  { %v629_v53 = vsel %vm628_vm2, %v626_v52, -inf }
 0x297   :  { %630 = vmax.xlane.f32.xlu1 %v629_v53 }
 0x324   :  { %v631_v42 = vpop.xlane.xlu1 %630 }
 0x325   :  { %v636_v54 = vrot.slane %v631_v42, %v1056_v44  ;;  %v640_v55 = vrot.slane %v631_v42, %v1063_v47 }
 0x327   :  { %v643_v56 = vsub.f32 %v611_v46, %v636_v54  ;;  %v644_v57 = vsub.f32 %v612_v49, %v640_v55 }
 0x329   :  { %v645_v43 = vmul.f32 1.442695, %v643_v56  ;;  %v647_v58 = vmul.f32 1.442695, %v644_v57 }
 0x32b   :  { %865 = vpow2.f32 %v645_v43 }
 0x32c   :  { %867 = vpow2.f32 %v647_v58 }
 0x335   :  { %v866_v59 = vpop.eup %865 }
 0x336   :  { %v868_v60 = vpop.eup %867  ;;  %652 = vperm.xlu1 %818, %v866_v59  }
 0x337   :  { %655 = vperm.xlu0 %819, %v868_v60  }
 0x3b5   :  { %v653_v61 = vpop.permute.xlu1 %652 }
 0x3b6   :  { %v656_v62 = vpop.permute.xlu0 %655  ;;  %v660_v63 = vrot.slane %v653_v61, %v619_v45 }
 0x3b7   :  { %v664_v0 = vrot.slane %v656_v62, %v619_v45 }
 0x3b9   :  { %v665_v1 = vsel %vm625_vm1, %v664_v0, %v660_v63 }
 0x3ba   :  { %v667_v2 = vsel %vm628_vm2, %v665_v1, 0.0 }
 0x3bb   :  { %668 = vadd.xlane.f32.xlu1 %v667_v2 }
 0x448   :  { %v669_v3 = vpop.xlane.xlu1 %668 }
 0x449   :  { %v674_v4 = vrot.slane %v669_v3, %v1056_v44  ;;  %v678_v5 = vrot.slane %v669_v3, %v1063_v47 }
 0x44b   :  { %869 = vrcp.f32 %v674_v4 }
 0x44c   :  { %871 = vrcp.f32 %v678_v5 }
 0x455   :  { %v870_v6 = vpop.eup %869 }
 0x456   :  { %v682_v7 = vmul.f32 %v870_v6, %v866_v59  ;;  %v872_v8 = vpop.eup %871 }
 0x457   :  { %v684_v9 = vmul.f32 %v872_v8, %v868_v60 }
 0x458   :  { %688 = vperm.xlu0 %819, %v682_v7  }
 0x45c   :  { %691 = vperm.xlu0 %819, %v684_v9  }
 0x4d7   :  { %v689_v10 = vpop.permute.xlu0 %688 }
 0x4d8   :  { %v696_v12 = vrot.slane %v689_v10, %v619_v45 }
 0x4db   :  { %v692_v11 = vpop.permute.xlu0 %691 }
 0x4dc   :  { %v700_v13 = vrot.slane %v692_v11, %v619_v45 }
 0x4de   :  { %v701_v14 = vsel %vm625_vm1, %v700_v13, %v696_v12 }
 0x4df   :  { %703 = vst.msk [vmem:[#allocation9] sm:$0x3] %vm628_vm2, %v701_v14 }
 0x4e0   :  { %950 = shalt.err (!%p947_p0)
}
 0x4e1   :  { %s951_s24 = scalar_lea.hbm %s1108_s7, 32 }
 0x4e2   :  { %p952_p1 = scmp.ne.s32.totalorder %s1108_s7, %s951_s24  ;;  %p955_p2 = scmp.lt.u32.totalorder %s951_s24, %s1108_s7 }
 0x4e4   :  { %p957_p3 = pnand %p955_p2, %p952_p1 }
 0x4e6   :  { %960 = shalt.err (!%p957_p3)
}
 0x4e7   :  { %713 = dma.vmem_to_hbm [thread:$0]  %s711_s6, 32, %s1108_s7, [#allocation5]  }
 0x4e8   :  { %965 = dma.done.wait [#allocation5], 32  }
 0x4e9   :  { %966 = vsyncadd [#allocation5], 4294967264 }
 0x4ea   :  { %717 = vsyncpa [#allocation4], 1 }
 0x4eb   :  { %718 = vsyncpa [#allocation7], 1 }
 0x4ec   :  { %719 = vsyncpa [#allocation5], 1 }

</bundles_post_ra>
